<compile_context>
chip_gen: v7x
topology: tpu7x:2x2x1
jax: 0.10.0
libtpu: 0.0.40
codegen_flags: <defaults>
</compile_context>

<pallas_src>
import functools

import jax
import jax.numpy as jnp
from jax import lax
from jax.experimental import pallas as pl
from jax.experimental.pallas import tpu as pltpu


def _reduce_scale_kernel(x_ref, w1_ref, w2_ref, scale_ref, sum_acc, max_acc,
                         *, S, Ts):
    # x_ref:     (1, C, Ts) spatial tile of one batch element (lane axis = S)
    # w1_ref:    (Hd, C)  == Conv3d(C, Hd, 1).weight[..., 0, 0, 0]
    # w2_ref:    (C, Hd)  == Conv3d(Hd, C, 1).weight[..., 0, 0, 0]
    # scale_ref: (1, C, 1) per-channel sigmoid gate for this batch element
    # sum_acc/max_acc: (C, 1) f32 running stats (persist across the S grid axis)
    s = pl.program_id(1)

    @pl.when(s == 0)
    def _():
        sum_acc[...] = jnp.zeros_like(sum_acc)
        max_acc[...] = jnp.full_like(max_acc, -jnp.inf)

    x = x_ref[0]                                      # (C, Ts), native dtype
    if S % Ts != 0:
        # Tail tile: mask padded lanes (identity for sum=0, for max=-inf).
        valid = S - s * Ts                            # >= Ts for non-tail tiles
        lane = lax.broadcasted_iota(jnp.int32, x.shape, 1)
        m = lane < valid
        x_sum = jnp.where(m, x, jnp.zeros((), x.dtype))
        x_max = jnp.where(m, x, jnp.full((), -jnp.inf, x.dtype))
    else:
        x_sum = x
        x_max = x

    # Lane-axis (XLU) reductions with f32 accumulation.
    sum_acc[...] += jnp.sum(x_sum, axis=1, keepdims=True, dtype=jnp.float32)
    max_acc[...] = jnp.maximum(
        max_acc[...], jnp.max(x_max, axis=1, keepdims=True).astype(jnp.float32))

    @pl.when(s == pl.num_programs(1) - 1)
    def _():
        avg = sum_acc[...] * jnp.float32(1.0 / S)      # (C, 1), true-S mean
        mx = max_acc[...]                              # (C, 1)
        # Pack [avg | max] as two columns and run the FC chain once.
        col = lax.broadcasted_iota(jnp.int32, (avg.shape[0], 2), 1)
        pooled = jnp.where(col == 0, avg, mx)          # (C, 2)

        w1 = w1_ref[...].astype(jnp.float32)           # (Hd, C)
        w2 = w2_ref[...].astype(jnp.float32)           # (C, Hd)
        h = jnp.maximum(
            jnp.dot(w1, pooled, preferred_element_type=jnp.float32), 0.0)  # (Hd, 2)
        logits2 = jnp.dot(w2, h, preferred_element_type=jnp.float32)       # (C, 2)
        logits = jnp.sum(logits2, axis=1, keepdims=True)   # fc(avg) + fc(max)
        scale_ref[0] = jax.nn.sigmoid(logits)              # (C, 1), f32


def _apply_kernel(scale_ref, x_ref, o_ref):
    # scale_ref: (1, C, 1) f32; x_ref/o_ref: (1, C, Ts) in native dtype.
    scale = scale_ref[0].astype(x_ref.dtype)           # (C, 1)
    o_ref[0] = x_ref[0] * scale                        # broadcast along lanes


def channel_attention_3d(x_ncdhw, w1, w2, *, s_tile=2048):
    """x_ncdhw: (N, C, D, H, W); w1: (C//r, C); w2: (C, C//r).  Returns NCDHW."""
    N, C, D, H, W = x_ncdhw.shape
    S = D * H * W
    hidden = w1.shape[0]

    # NCDHW -> (N, C, S): contiguous collapse of the trailing dims (no copy).
    x_ncs = x_ncdhw.reshape(N, C, S)

    # Spatial tile: full S if it fits the target, else a multiple of 128 lanes.
    if S <= s_tile:
        Ts = S
    else:
        Ts = (s_tile // 128) * 128
        assert Ts >= 128, "s_tile must be >= 128 when S is tiled"
    n_s = pl.cdiv(S, Ts)

    xbytes = jnp.dtype(x_ncdhw.dtype).itemsize
    tile_bytes = C * Ts * xbytes
    # double-buffered input (+output) tiles + weights/stats + headroom
    reduce_vmem = int(min(2 * tile_bytes + (8 << 20), 48 << 20))
    apply_vmem = int(min(4 * tile_bytes + (8 << 20), 48 << 20))

    # Pass 1: pooled stats -> tiny MLP -> sigmoid => (N, C, 1) scale.
    scale = pl.pallas_call(
        functools.partial(_reduce_scale_kernel, S=S, Ts=Ts),
        out_shape=jax.ShapeDtypeStruct((N, C, 1), jnp.float32),
        grid_spec=pltpu.PrefetchScalarGridSpec(
            num_scalar_prefetch=0,
            grid=(N, n_s),
            in_specs=[
                pl.BlockSpec((1, C, Ts), lambda n, s: (n, 0, s)),
                pl.BlockSpec((hidden, C), lambda n, s: (0, 0)),
                pl.BlockSpec((C, hidden), lambda n, s: (0, 0)),
            ],
            out_specs=pl.BlockSpec((1, C, 1), lambda n, s: (n, 0, 0)),
            scratch_shapes=[pltpu.VMEM((C, 1), jnp.float32),
                            pltpu.VMEM((C, 1), jnp.float32)],
        ),
        compiler_params=pltpu.CompilerParams(
            dimension_semantics=("parallel", "arbitrary"),
            vmem_limit_bytes=reduce_vmem),
    )(x_ncs, w1, w2)

    # Pass 2: broadcast the per-channel gate along the lane axis and apply.
    out_ncs = pl.pallas_call(
        _apply_kernel,
        out_shape=jax.ShapeDtypeStruct((N, C, S), x_ncdhw.dtype),
        grid_spec=pltpu.PrefetchScalarGridSpec(
            num_scalar_prefetch=0,
            grid=(N, n_s),
            in_specs=[
                pl.BlockSpec((1, C, 1), lambda n, s: (n, 0, 0)),
                pl.BlockSpec((1, C, Ts), lambda n, s: (n, 0, s)),
            ],
            out_specs=pl.BlockSpec((1, C, Ts), lambda n, s: (n, 0, s)),
        ),
        compiler_params=pltpu.CompilerParams(
            dimension_semantics=("parallel", "parallel"),
            vmem_limit_bytes=apply_vmem),
    )(scale, x_ncs)

    # (N, C, S) -> NCDHW (free reshape).
    return out_ncs.reshape(N, C, D, H, W)


def _reference(x, w1, w2):
    """Pure-JAX reference matching the PyTorch forward exactly."""
    avg = jnp.mean(x, axis=(2, 3, 4))                  # (N, C)
    mx = jnp.max(x, axis=(2, 3, 4))                    # (N, C)

    def fc(v):
        h = jnp.maximum(v @ w1.T, 0.0)                 # (N, C//r)
        return h @ w2.T                                # (N, C)

    scale = jax.nn.sigmoid(fc(avg) + fc(mx))           # (N, C)
    return scale[:, :, None, None, None] * x


if __name__ == "__main__":
    key = jax.random.PRNGKey(0)
    kx, k1, k2, kx2 = jax.random.split(key, 4)

    # Module defaults: in_planes=64, ratio=8 -> hidden=8.  Small spatial volume.
    N, C, D, H, W = 2, 64, 4, 4, 4
    ratio = 8
    hidden = C // ratio

    x = jax.random.normal(kx, (N, C, D, H, W), dtype=jnp.float32)
    # Conv3d weights with the trailing 1x1x1 dims squeezed off.
    w1 = jax.random.normal(k1, (hidden, C), dtype=jnp.float32) * 0.1
    w2 = jax.random.normal(k2, (C, hidden), dtype=jnp.float32) * 0.1

    out = jax.block_until_ready(channel_attention_3d(x, w1, w2))
    ref = _reference(x, w1, w2)
    assert out.shape == (N, C, D, H, W)
    assert jnp.allclose(out, ref, atol=1e-5, rtol=1e-5), "mismatch (single tile)"

    # Second check: forces multiple spatial tiles with a masked tail tile
    # (S = 4*24*24 = 2304, tile = 1024 -> 3 tiles, last one partial).
    x2 = jax.random.normal(kx2, (1, C, 4, 24, 24), dtype=jnp.float32)
    out2 = jax.block_until_ready(channel_attention_3d(x2, w1, w2, s_tile=1024))
    ref2 = _reference(x2, w1, w2)
    assert jnp.allclose(out2, ref2, atol=1e-5, rtol=1e-5), "mismatch (tiled S)"

    print("KERNEL_OK")
</pallas_src>

<mosaic_0001>
module attributes {stable_mosaic.version = 11 : i64} {
  func.func @_reduce_scale_kernel(%arg0: i32, %arg1: i32, %arg2: memref<1x64x64xf32, #tpu.memory_space<vmem>>, %arg3: memref<8x64xf32, #tpu.memory_space<vmem>>, %arg4: memref<64x8xf32, #tpu.memory_space<vmem>>, %arg5: memref<1x64x1xf32, #tpu.memory_space<vmem>>, %arg6: memref<64x1xf32, #tpu.memory_space<vmem>>, %arg7: memref<64x1xf32, #tpu.memory_space<vmem>>) attributes {dimension_semantics = [#tpu.dimension_semantics<parallel>, #tpu.dimension_semantics<arbitrary>], iteration_bounds = array<i64: 2, 1>, scalar_prefetch = 0 : i64, scratch_operands = 2 : i64, tpu.core_type = #tpu.core_type<tc>, window_params = [{transform_indices = @transform_0, window_bounds = array<i64: 1, 64, 64>}, {pipeline_mode = #tpu.pipeline_mode<synchronous>, transform_indices = @transform_1, window_bounds = array<i64: 8, 64>}, {pipeline_mode = #tpu.pipeline_mode<synchronous>, transform_indices = @transform_2, window_bounds = array<i64: 64, 8>}, {transform_indices = @transform_3, window_bounds = array<i64: 1, 64, 1>}]} {
    %c0_i32 = arith.constant 0 : i32
    %0 = arith.cmpi eq, %arg1, %c0_i32 : i32
    %1 = arith.extui %0 : i1 to i32
    %c0_i32_0 = arith.constant 0 : i32
    %2 = arith.cmpi ne, %1, %c0_i32_0 : i32
    scf.if %2 {
      %cst_14 = arith.constant 0.000000e+00 : f32
      %18 = vector.broadcast %cst_14 : f32 to vector<64x1xf32>
      %c0_15 = arith.constant 0 : index
      %c0_16 = arith.constant 0 : index
      %19 = vector.load %arg6[%c0_15, %c0_16] : memref<64x1xf32, #tpu.memory_space<vmem>>, vector<64x1xf32>
      tpu.vector_store %arg6[%c0_15, %c0_16], %18 {strides = array<i32>} : memref<64x1xf32, #tpu.memory_space<vmem>>, vector<64x1xf32>,
      %cst_17 = arith.constant 0xFF800000 : f32
      %20 = vector.broadcast %cst_17 : f32 to vector<64x1xf32>
      %c0_18 = arith.constant 0 : index
      %c0_19 = arith.constant 0 : index
      %21 = vector.load %arg7[%c0_18, %c0_19] : memref<64x1xf32, #tpu.memory_space<vmem>>, vector<64x1xf32>
      tpu.vector_store %arg7[%c0_18, %c0_19], %20 {strides = array<i32>} : memref<64x1xf32, #tpu.memory_space<vmem>>, vector<64x1xf32>,
    } else {
    }
    %c0 = arith.constant 0 : index
    %c0_1 = arith.constant 0 : index
    %c0_2 = arith.constant 0 : index
    %3 = vector.load %arg2[%c0, %c0_1, %c0_2] : memref<1x64x64xf32, #tpu.memory_space<vmem>>, vector<1x64x64xf32>
    %4 = vector.shape_cast %3 : vector<1x64x64xf32> to vector<64x64xf32>
    %c0_3 = arith.constant 0 : index
    %c0_4 = arith.constant 0 : index
    %5 = vector.load %arg6[%c0_3, %c0_4] : memref<64x1xf32, #tpu.memory_space<vmem>>, vector<64x1xf32>
    %cst = arith.constant dense<0.000000e+00> : vector<64xf32>
    %6 = vector.multi_reduction <add>, %4, %cst [1] : vector<64x64xf32> to vector<64xf32>
    %7 = vector.shape_cast %6 : vector<64xf32> to vector<64x1xf32>
    %8 = arith.addf %5, %7 : vector<64x1xf32>
    %c0_5 = arith.constant 0 : index
    %c0_6 = arith.constant 0 : index
    %9 = vector.load %arg6[%c0_5, %c0_6] : memref<64x1xf32, #tpu.memory_space<vmem>>, vector<64x1xf32>
    tpu.vector_store %arg6[%c0_5, %c0_6], %8 {strides = array<i32>} : memref<64x1xf32, #tpu.memory_space<vmem>>, vector<64x1xf32>,
    %c0_7 = arith.constant 0 : index
    %c0_8 = arith.constant 0 : index
    %10 = vector.load %arg7[%c0_7, %c0_8] : memref<64x1xf32, #tpu.memory_space<vmem>>, vector<64x1xf32>
    %cst_9 = arith.constant dense<0xFF800000> : vector<64xf32>
    %11 = vector.multi_reduction <maximumf>, %4, %cst_9 [1] : vector<64x64xf32> to vector<64xf32>
    %12 = vector.shape_cast %11 : vector<64xf32> to vector<64x1xf32>
    %13 = arith.maximumf %10, %12 : vector<64x1xf32>
    %c0_10 = arith.constant 0 : index
    %c0_11 = arith.constant 0 : index
    %14 = vector.load %arg7[%c0_10, %c0_11] : memref<64x1xf32, #tpu.memory_space<vmem>>, vector<64x1xf32>
    tpu.vector_store %arg7[%c0_10, %c0_11], %13 {strides = array<i32>} : memref<64x1xf32, #tpu.memory_space<vmem>>, vector<64x1xf32>,
    %c0_i32_12 = arith.constant 0 : i32
    %15 = arith.cmpi eq, %arg1, %c0_i32_12 : i32
    %16 = arith.extui %15 : i1 to i32
    %c0_i32_13 = arith.constant 0 : i32
    %17 = arith.cmpi ne, %16, %c0_i32_13 : i32
    scf.if %17 {
      %c0_14 = arith.constant 0 : index
      %c0_15 = arith.constant 0 : index
      %18 = vector.load %arg6[%c0_14, %c0_15] : memref<64x1xf32, #tpu.memory_space<vmem>>, vector<64x1xf32>
      %cst_16 = arith.constant 1.562500e-02 : f32
      %19 = vector.broadcast %cst_16 : f32 to vector<64x1xf32>
      %20 = arith.mulf %18, %19 : vector<64x1xf32>
      %c0_17 = arith.constant 0 : index
      %c0_18 = arith.constant 0 : index
      %21 = vector.load %arg7[%c0_17, %c0_18] : memref<64x1xf32, #tpu.memory_space<vmem>>, vector<64x1xf32>
      %22 = tpu.iota {dimensions = array<i32: 1>} : vector<64x2xi32>
      %c0_i32_19 = arith.constant 0 : i32
      %23 = vector.broadcast %c0_i32_19 : i32 to vector<64x2xi32>
      %24 = arith.cmpi eq, %22, %23 : vector<64x2xi32>
      %25 = vector.shape_cast %20 : vector<64x1xf32> to vector<64x1xf32>
      %26 = vector.broadcast %25 : vector<64x1xf32> to vector<64x2xf32>
      %27 = vector.shape_cast %21 : vector<64x1xf32> to vector<64x1xf32>
      %28 = vector.broadcast %27 : vector<64x1xf32> to vector<64x2xf32>
      %29 = arith.select %24, %26, %28 : vector<64x2xi1>, vector<64x2xf32>
      %c0_20 = arith.constant 0 : index
      %c0_21 = arith.constant 0 : index
      %30 = vector.load %arg3[%c0_20, %c0_21] : memref<8x64xf32, #tpu.memory_space<vmem>>, vector<8x64xf32>
      %c0_22 = arith.constant 0 : index
      %c0_23 = arith.constant 0 : index
      %31 = vector.load %arg4[%c0_22, %c0_23] : memref<64x8xf32, #tpu.memory_space<vmem>>, vector<64x8xf32>
      %cst_24 = arith.constant dense<0.000000e+00> : vector<8x2xf32>
      %32 = tpu.matmul %30, %29, %cst_24 {dimension_numbers = #tpu.dot_dimension_numbers<[1], [0], [0], [1], [0, 0, 1, 1], [], []>} : vector<8x64xf32>, vector<64x2xf32>, vector<8x2xf32> -> vector<8x2xf32>
      %cst_25 = arith.constant 0.000000e+00 : f32
      %33 = vector.broadcast %cst_25 : f32 to vector<8x2xf32>
      %34 = arith.maximumf %32, %33 : vector<8x2xf32>
      %cst_26 = arith.constant dense<0.000000e+00> : vector<64x2xf32>
      %35 = tpu.matmul %31, %34, %cst_26 {dimension_numbers = #tpu.dot_dimension_numbers<[1], [0], [0], [1], [0, 0, 1, 1], [], []>} : vector<64x8xf32>, vector<8x2xf32>, vector<64x2xf32> -> vector<64x2xf32>
      %cst_27 = arith.constant dense<0.000000e+00> : vector<64xf32>
      %36 = vector.multi_reduction <add>, %35, %cst_27 [1] : vector<64x2xf32> to vector<64xf32>
      %37 = vector.shape_cast %36 : vector<64xf32> to vector<64x1xf32>
      %38 = arith.negf %37 : vector<64x1xf32>
      %39 = math.exp %38 : vector<64x1xf32>
      %cst_28 = arith.constant 1.000000e+00 : f32
      %40 = vector.broadcast %cst_28 : f32 to vector<64x1xf32>
      %41 = arith.addf %40, %39 : vector<64x1xf32>
      %42 = arith.divf %40, %41 : vector<64x1xf32>
      %c0_29 = arith.constant 0 : index
      %c0_30 = arith.constant 0 : index
      %c0_31 = arith.constant 0 : index
      %43 = vector.load %arg5[%c0_29, %c0_30, %c0_31] : memref<1x64x1xf32, #tpu.memory_space<vmem>>, vector<1x64x1xf32>
      %44 = vector.shape_cast %43 : vector<1x64x1xf32> to vector<64x1xf32>
      %45 = vector.shape_cast %42 : vector<64x1xf32> to vector<1x64x1xf32>
      tpu.vector_store %arg5[%c0_29, %c0_30, %c0_31], %45 {strides = array<i32>} : memref<1x64x1xf32, #tpu.memory_space<vmem>>, vector<1x64x1xf32>,
    } else {
    }
    return
  }
  func.func @transform_0(%arg0: i32, %arg1: i32) -> (i32, i32, i32) {
    %c0_i32 = arith.constant 0 : i32
    %c0_i32_0 = arith.constant 0 : i32
    return %arg0, %c0_i32, %arg1 : i32, i32, i32
  }
  func.func @transform_1(%arg0: i32, %arg1: i32) -> (i32, i32) {
    %c0_i32 = arith.constant 0 : i32
    %c0_i32_0 = arith.constant 0 : i32
    %c0_i32_1 = arith.constant 0 : i32
    return %c0_i32, %c0_i32_0 : i32, i32
  }
  func.func @transform_2(%arg0: i32, %arg1: i32) -> (i32, i32) {
    %c0_i32 = arith.constant 0 : i32
    %c0_i32_0 = arith.constant 0 : i32
    %c0_i32_1 = arith.constant 0 : i32
    return %c0_i32, %c0_i32_0 : i32, i32
  }
  func.func @transform_3(%arg0: i32, %arg1: i32) -> (i32, i32, i32) {
    %c0_i32 = arith.constant 0 : i32
    %c0_i32_0 = arith.constant 0 : i32
    %c0_i32_1 = arith.constant 0 : i32
    return %arg0, %c0_i32, %c0_i32_0 : i32, i32, i32
  }
}

</mosaic_0001>

<bundles_post_ra>
// kernel: tpu_custom_call.1
= control target key start
LH: loop header
LB: loop body
LE: loop exit
PB: predicated region body
PF: predicated region fallthrough
CT: control target
= control target key end

     0   :  { %8 = vsyncpa [#allocation5], 0  ;;  %s1418_s0 = inlined_call_operand.hbm [shape: f32[2,64,64], index: 0, kind: input, shape index: {}]   ;;  %s1419_s1 = inlined_call_operand.vmem [shape: f32[8,64], index: 1, kind: input, shape index: {}]   ;;  %s1420_s2 = inlined_call_operand.vmem [shape: f32[64,8], index: 2, kind: input, shape index: {}]   ;;  %s1421_s3 = inlined_call_operand.vmem [shape: f32[2,64,1], index: 3, kind: output, shape index: {}]  }
   0x1   :  { %10 = vsyncpa [#allocation5 + $0x1], 0  ;;  %s1163_s12 = smov 0   ;;  %s1165_s13 = smov 0  }
   0x2   :  { %s1167_s14 = smov 0   ;;  %s1169_s15 = smov 0  }
   0x3   :  { %s1171_s16 = smov 0   ;;  %s1173_s17 = smov 0  }
   0x4 LB: > { %s822_s18 = sadd.s32 4294967295, %s1133_s17   ;;  %s28_s19 = sadd.s32 1, %s1129_s16  ;;  %s1133_s17 = sphi %s1173_s17, %s16_s17   ;;  %s1129_s16 = sphi %s1171_s16, %s1429_s16   ;;  %s1125_s15 = sphi %s1169_s15, %s1428_s15   ;;  %s1121_s14 = sphi %s1167_s14, %s1427_s14   ;;  %s1117_s13 = sphi %s1165_s13, %s1426_s13   ;;  %s1113_s12 = sphi %s1163_s12, %s1425_s12  }
   0x5   : > { %p30_p0 = scmp.ge.s32.totalorder %s28_s19, 2  ;;  %s37_s20 = sadd.s32 1, %s1121_s14 }
   0x6   : > { %p44_p1 = scmp.ne.s32.totalorder %s1121_s14, %s1117_s13  ;;  %p45_p2 = scmp.eq.s32.totalorder %s1133_s17, 0 }
   0x7   : > { %s1431_s19 = smov (%p30_p0, %s28_s19), 0  ;;  %p50_p4 = scmp.ne.s32.totalorder %s1117_s13, %s1113_s12 }
   0x8   : > { %p1199_p3 = por %p45_p2, %p44_p1  ;;  %s32_s22 = ssub.s32 %s1129_s16, %s1431_s19 }
   0x9   : > { %p51_p5 = scmp.eq.s32.totalorder %s822_s18, 0  ;;  %p35_p6 = scmp.eq.s32.totalorder %s32_s22, 0 }
   0xa   : > { %p923_p8 = scmp.lt.s32.totalorder %s1133_s17, 2  ;;  %s148_s25 = sand.u32 1, %s1121_s14  }
   0xb   : > { %p1206_p7 = por %p51_p5, %p50_p4  ;;  %s852_s26 = sshll.u32 %s1129_s16, 10 }
   0xc   : > { %s1212_s24 = scalar_select %p35_p6, %s1121_s14, %s37_s20  }
   0xd   : > { %s826_s27 = sshll.u32 %s148_s25, 6  ;;  %s1219_s30 = scalar_lea.hbm %s1418_s0, %s852_s26 }
   0xe   : > { %s152_s4 = scalar_lea.vmem [#allocation4], %s826_s27  ;;  %p1223_p9 = pnand %p923_p8, %p1199_p3 }
   0xf   : > { %s160_s5 = sshll.u32 %s152_s4, 4  ;;  %s1229_s7 = scalar_lea.sflag [#allocation5], %s148_s25  ;;  %s1227_s5 = int_to_ptr.vmem [resolvable:$true] %s160_s5 }
  0x10   : > { %s1053_s8 = scalar_lea.hbm %s1219_s30, 1024  ;;  %p1055_p11 = pneg %p1223_p9 }
  0x11   : > { %p1054_p10 = scmp.ne.s32.totalorder %s1219_s30, %s1053_s8  ;;  %s1058_s11 = scalar_lea.hbm %s1418_s0, 2048 }
  0x12   : > { %p1059_p0 = scmp.lt.u32.totalorder %s1219_s30, %s1418_s0  ;;  %p1060_p1 = scmp.lt.u32.totalorder %s1058_s11, %s1053_s8 }
  0x13   : > { %p1056_p12 = pnand %p1055_p11, %p1054_p10  ;;  %p1062_p3 = scmp.lt.u32.totalorder %s1053_s8, %s1219_s30 }
  0x14   : > { %p1061_p2 = por %p1060_p1, %p1059_p0 }
  0x15   : > { %p1057_p13 = pneg %p1056_p12 }
  0x16   : > { %p1063_p4 = por %p1062_p3, %p1061_p2 }
  0x18   : > { %p1064_p5 = pnand %p1063_p4, %p1057_p13 }
  0x1a   : > { %1067 = shalt.err (!%p1064_p5)
}
  0x1b   : > { %s1068_s20 = scalar_lea.vmem %s1227_s5, 1024  ;;  %s1135_s21 = smov [#allocation4]  }
  0x1c   : > { %p1069_p6 = scmp.ne.s32.totalorder %s1227_s5, %s1068_s20  ;;  %s1073_s22 = sshll.u32 %s1135_s21, 4  ;;  %s1074_s22 = int_to_ptr.vmem [resolvable:$false] %s1073_s22 }
  0x1d   : > { %s1075_s25 = scalar_lea.vmem %s1074_s22, 2048  ;;  %p1076_p12 = scmp.lt.s32.totalorder %s1227_s5, %s1074_s22 }
  0x1e   : > { %p1071_p8 = pnand %p1069_p6, %p1055_p11  ;;  %p1077_p0 = scmp.lt.s32.totalorder %s1075_s25, %s1068_s20 }
  0x20   : > { %p1072_p10 = pneg %p1071_p8  ;;  %p1078_p1 = por %p1077_p0, %p1076_p12 }
  0x22   : > { %p1079_p2 = pnand %p1078_p1, %p1072_p10 }
  0x24   : > { %1082 = shalt.err (!%p1079_p2)
}
  0x25   : > { %s1136_s26 = smov 128   ;;  %s1137_s27 = smov 8  }
  0x26   : > { %922 = dma.hbm_to_vmem [thread:$0]  (!%p1223_p9), %s1219_s30, 1024, %s1227_s5, %s1229_s7, %s1136_s26, %s1136_s26, %s1137_s27  }
  0x27   : > { %p829_p11 = scmp.ge.s32.totalorder %s1133_s17, 1  ;;  %p168_p13 = scmp.lt.s32.totalorder %s1133_s17, 3 }
  0x29   : > { %p169_p3 = pnand %p829_p11, %p168_p13 }
  0x2a   : > { %s174_s28 = sand.u32 (!%p169_p3), 1, %s1117_s13  }
  0x2b   : > { %172 = sbr.rel (%p169_p3) target bundleno = 993 (0x3e1), region = 32  ;;  %s830_s29 = sshll.u32 (!%p169_p3), %s174_s28, 6 }
  0x2c   : > { %s175_s4 = scalar_lea.sflag (!%p169_p3), [#allocation5], %s174_s28  ;;  %s1260_s8 = scalar_lea.vmem (!%p169_p3), [#allocation4], %s830_s29 }
  0x32   : > { %1108 = dma.done.wait (%p1206_p7), %s175_s4, 1024  }
  0x33   : > { %1110 = vsyncadd (%p1206_p7), %s175_s4, 4294966272  ;;  %vm210_vm0 = vcmask 7168   ;;  %v1138_v0 = vmov -inf   ;;  %vm243_vm1 = vcmask 523264   ;;  %v227_v1 = vld [vmem:[%s1260_s8] sm:$0xff]  ;;  %v228_v2 = vld [vmem:[%s1260_s8 + $0x8] sm:$0xff] }
  0x34   : > { %219 = vst.msk [vmem:[#allocation3] sm:$0xff] %vm210_vm0, %v1138_v0  ;;  %220 = vst.msk [vmem:[#allocation3 + $0x8] sm:$0xff] %vm210_vm0, %v1138_v0  ;;  %v293_v3 = vsel %vm243_vm1, %v227_v1, -inf  ;;  %v244_v4 = vsel %vm243_vm1, %v227_v1, 0.0  ;;  %v296_v5 = vsel %vm243_vm1, %v228_v2, -inf  ;;  %v247_v6 = vsel %vm243_vm1, %v228_v2, 0.0 }
  0x35   : > { %221 = vst.msk [vmem:[#allocation3 + $0x10] sm:$0xff] %vm210_vm0, %v1138_v0  ;;  %222 = vst.msk [vmem:[#allocation3 + $0x18] sm:$0xff] %vm210_vm0, %v1138_v0  ;;  %294 = vmax.xlane.f32.xlu1 %v293_v3  ;;  %245 = vadd.xlane.f32.xlu0 %v244_v4  ;;  %v230_v7 = vld [vmem:[%s1260_s8 + $0x18] sm:$0xff]  ;;  %v229_v8 = vld [vmem:[%s1260_s8 + $0x10] sm:$0xff]  ;;  %v1139_v11 = vmov 0.0   ;;  %v1140_v26 = vmov 0  }
  0x36   : > { %223 = vst.msk [vmem:[#allocation3 + $0x20] sm:$0xff] %vm210_vm0, %v1138_v0  ;;  %224 = vst.msk [vmem:[#allocation3 + $0x28] sm:$0xff] %vm210_vm0, %v1138_v0  ;;  %v253_v9 = vsel %vm243_vm1, %v230_v7, 0.0  ;;  %v250_v10 = vsel %vm243_vm1, %v229_v8, 0.0  ;;  %v302_v12 = vsel %vm243_vm1, %v230_v7, -inf  ;;  %v299_v13 = vsel %vm243_vm1, %v229_v8, -inf  ;;  %985 = vset.pattern.permute.xlu1 %v1140_v26  ;;  %979 = vset.pattern.permute.xlu0 %v1140_v26 }
  0x37   : > { %225 = vst.msk [vmem:[#allocation3 + $0x30] sm:$0xff] %vm210_vm0, %v1138_v0  ;;  %226 = vst.msk [vmem:[#allocation3 + $0x38] sm:$0xff] %vm210_vm0, %v1138_v0  ;;  %v232_v14 = vld [vmem:[%s1260_s8 + $0x28] sm:$0xff]  ;;  %v231_v15 = vld [vmem:[%s1260_s8 + $0x20] sm:$0xff]  ;;  %vm1142_vm2 = vmmov 0   ;;  %vm534_vm4 = vcmask 64512  }
  0x38   : > { %211 = vst.msk [vmem:[#allocation2] sm:$0xff] %vm210_vm0, %v1139_v11  ;;  %212 = vst.msk [vmem:[#allocation2 + $0x8] sm:$0xff] %vm210_vm0, %v1139_v11  ;;  %v259_v16 = vsel %vm243_vm1, %v232_v14, 0.0  ;;  %v256_v17 = vsel %vm243_vm1, %v231_v15, 0.0  ;;  %v308_v18 = vsel %vm243_vm1, %v232_v14, -inf  ;;  %v305_v19 = vsel %vm243_vm1, %v231_v15, -inf  ;;  %888 = vmatprep.mubr.msk.f32.mxu0 %vm1142_vm2, %v1139_v11 }
  0x39   : > { %297 = vmax.xlane.f32.xlu1 %v296_v5  ;;  %248 = vadd.xlane.f32.xlu0 %v247_v6  ;;  %213 = vst.msk [vmem:[#allocation2 + $0x10] sm:$0xff] %vm210_vm0, %v1139_v11  ;;  %214 = vst.msk [vmem:[#allocation2 + $0x18] sm:$0xff] %vm210_vm0, %v1139_v11  ;;  %v234_v20 = vld [vmem:[%s1260_s8 + $0x38] sm:$0xff]  ;;  %v233_v21 = vld [vmem:[%s1260_s8 + $0x30] sm:$0xff]  ;;  %v1141_v5 = vmov 0.0|0.0   ;;  %vm664_vm5 = vcmask 15360  }
  0x3a   : > { %215 = vst.msk [vmem:[#allocation2 + $0x20] sm:$0xff] %vm210_vm0, %v1139_v11  ;;  %216 = vst.msk [vmem:[#allocation2 + $0x28] sm:$0xff] %vm210_vm0, %v1139_v11  ;;  %v265_v22 = vsel %vm243_vm1, %v234_v20, 0.0  ;;  %v262_v23 = vsel %vm243_vm1, %v233_v21, 0.0  ;;  %v314_v24 = vsel %vm243_vm1, %v234_v20, -inf  ;;  %v311_v25 = vsel %vm243_vm1, %v233_v21, -inf  ;;  %905 = vmatprep.subr.bf16.mxu0 %v1141_v5 }
  0x3b   : > { %217 = vst.msk [vmem:[#allocation2 + $0x30] sm:$0xff] %vm210_vm0, %v1139_v11  ;;  %218 = vst.msk [vmem:[#allocation2 + $0x38] sm:$0xff] %vm210_vm0, %v1139_v11  ;;  %v285_v27 = vld [vmem:[#allocation3] sm:$0xff]  ;;  %v286_v33 = vld [vmem:[#allocation3 + $0x8] sm:$0xff]  ;;  %p201_p7 = scmp.lt.s32.totalorder %s1125_s15, 1 }
  0x3c   : > { %v288_v45 = vld [vmem:[#allocation3 + $0x18] sm:$0xff]  ;;  %v287_v46 = vld [vmem:[#allocation3 + $0x10] sm:$0xff] }
  0x3d   : > { %254 = vadd.xlane.f32.xlu1 %v253_v9  ;;  %251 = vadd.xlane.f32.xlu0 %v250_v10  ;;  %v290_v1 = vld [vmem:[#allocation3 + $0x28] sm:$0xff]  ;;  %v289_v2 = vld [vmem:[#allocation3 + $0x20] sm:$0xff]  ;;  %s1433_s15 = smov (!%p201_p7, %s1125_s15), 1 }
  0x3e   : > { %s853_s4 = sshll.u32 %s1433_s15, 6 }
  0x3f   : > { %v235_v28 = vld [vmem:[#allocation2] sm:$0xff]  ;;  %v236_v34 = vld [vmem:[#allocation2 + $0x8] sm:$0xff]  ;;  %s205_s30 = scalar_lea.vmem %s1421_s3, %s853_s4 }
  0x40   : > { %v238_v39 = vld [vmem:[#allocation2 + $0x18] sm:$0xff]  ;;  %v237_v40 = vld [vmem:[#allocation2 + $0x10] sm:$0xff] }
  0x41   : > { %303 = vmax.xlane.f32.xlu1 %v302_v12  ;;  %300 = vmax.xlane.f32.xlu0 %v299_v13  ;;  %v240_v52 = vld [vmem:[#allocation2 + $0x28] sm:$0xff]  ;;  %v239_v53 = vld [vmem:[#allocation2 + $0x20] sm:$0xff] }
  0x42   : > { %v242_v8 = vld [vmem:[#allocation2 + $0x38] sm:$0xff]  ;;  %v241_v12 = vld [vmem:[#allocation2 + $0x30] sm:$0xff] }
  0x45   : > { %260 = vadd.xlane.f32.xlu1 %v259_v16  ;;  %257 = vadd.xlane.f32.xlu0 %v256_v17 }
  0x49   : > { %309 = vmax.xlane.f32.xlu1 %v308_v18  ;;  %306 = vmax.xlane.f32.xlu0 %v305_v19  ;;  %v292_v18 = vld [vmem:[#allocation3 + $0x38] sm:$0xff]  ;;  %v291_v19 = vld [vmem:[#allocation3 + $0x30] sm:$0xff] }
  0x4d   : > { %266 = vadd.xlane.f32.xlu1 %v265_v22  ;;  %263 = vadd.xlane.f32.xlu0 %v262_v23 }
  0x51   : > { %315 = vmax.xlane.f32.xlu1 %v314_v24  ;;  %312 = vmax.xlane.f32.xlu0 %v311_v25 }
  0xc2   : > { %v295_v29 = vpop.xlane.xlu1 %294  ;;  %v246_v30 = vpop.xlane.xlu0 %245 }
  0xc3   : > { %v317_v31 = vmax.f32 %v285_v27, %v295_v29  ;;  %v268_v32 = vadd.f32 %v246_v30, %v235_v28 }
  0xc5   : > { %325 = vst.msk [vmem:[#allocation3] sm:$0xff] %vm210_vm0, %v317_v31  ;;  %277 = vst.msk [vmem:[#allocation2] sm:$0xff] %vm210_vm0, %v268_v32 }
  0xc6   : > { %v298_v35 = vpop.xlane.xlu1 %297  ;;  %v249_v36 = vpop.xlane.xlu0 %248 }
  0xc7   : > { %v318_v37 = vmax.f32 %v286_v33, %v298_v35  ;;  %v269_v38 = vadd.f32 %v249_v36, %v236_v34 }
  0xc9   : > { %326 = vst.msk [vmem:[#allocation3 + $0x8] sm:$0xff] %vm210_vm0, %v318_v37  ;;  %278 = vst.msk [vmem:[#allocation2 + $0x8] sm:$0xff] %vm210_vm0, %v269_v38 }
  0xca   : > { %v255_v41 = vpop.xlane.xlu1 %254  ;;  %v252_v42 = vpop.xlane.xlu0 %251 }
  0xcb   : > { %v271_v43 = vadd.f32 %v255_v41, %v238_v39  ;;  %v270_v44 = vadd.f32 %v252_v42, %v237_v40 }
  0xcc   : > { %v336_v49 = vld [vmem:[#allocation2] sm:$0xff] }
  0xcd   : > { %280 = vst.msk [vmem:[#allocation2 + $0x18] sm:$0xff] %vm210_vm0, %v271_v43  ;;  %279 = vst.msk [vmem:[#allocation2 + $0x10] sm:$0xff] %vm210_vm0, %v270_v44  ;;  %v352_v54 = vld [vmem:[#allocation3] sm:$0xff]  ;;  %v344_v58 = vmul.f32 0.015625, %v336_v49 }
  0xce   : > { %v304_v47 = vpop.xlane.xlu1 %303  ;;  %v301_v48 = vpop.xlane.xlu0 %300 }
  0xcf   : > { %v320_v50 = vmax.f32 %v288_v45, %v304_v47  ;;  %v319_v51 = vmax.f32 %v287_v46, %v301_v48  ;;  %v360_v45 = vlaneseq }
  0xd0   : > { %v353_v55 = vld [vmem:[#allocation3 + $0x8] sm:$0xff] }
  0xd1   : > { %v337_v56 = vld [vmem:[#allocation2 + $0x8] sm:$0xff]  ;;  %328 = vst.msk [vmem:[#allocation3 + $0x18] sm:$0xff] %vm210_vm0, %v320_v50  ;;  %327 = vst.msk [vmem:[#allocation3 + $0x10] sm:$0xff] %vm210_vm0, %v319_v51  ;;  %v986_v57 = vpack.i.bf16 %v353_v55, %v352_v54  ;;  %v361_v46 = vand.u32 127, %v360_v45 }
  0xd2   : > { %v345_v59 = vmul.f32 0.015625, %v337_v56  ;;  %v261_v60 = vpop.xlane.xlu1 %260  ;;  %v258_v61 = vpop.xlane.xlu0 %257 }
  0xd3   : > { %v273_v62 = vadd.f32 %v261_v60, %v240_v52  ;;  %v272_v63 = vadd.f32 %v258_v61, %v239_v53  ;;  %987 = vperm.xlu1 %985, %v986_v57   ;;  %vm362_vm3 = vcmp.eq.s32.totalorder %v361_v46, 0 }
  0xd4   : > { %v980_v0 = vpack.i.bf16 %v345_v59, %v344_v58  ;;  %v338_v22 = vld [vmem:[#allocation2 + $0x10] sm:$0xff]  ;;  %v339_v23 = vld [vmem:[#allocation2 + $0x18] sm:$0xff] }
  0xd5   : > { %282 = vst.msk [vmem:[#allocation2 + $0x28] sm:$0xff] %vm210_vm0, %v273_v62  ;;  %281 = vst.msk [vmem:[#allocation2 + $0x20] sm:$0xff] %vm210_vm0, %v272_v63  ;;  %v346_v29 = vmul.f32 0.015625, %v338_v22  ;;  %v347_v30 = vmul.f32 0.015625, %v339_v23 }
  0xd6   : > { %981 = vperm.xlu0 %979, %v980_v0   ;;  %v310_v3 = vpop.xlane.xlu1 %309  ;;  %v307_v4 = vpop.xlane.xlu0 %306 }
  0xd7   : > { %v322_v6 = vmax.f32 %v290_v1, %v310_v3  ;;  %v321_v7 = vmax.f32 %v289_v2, %v307_v4  ;;  %v1001_v35 = vpack.i.bf16 %v347_v30, %v346_v29  ;;  %v458_v29 = vld [vmem:[%s1420_s2 + $0x30] sm:$0xff]  ;;  %v459_v30 = vld [vmem:[%s1420_s2 + $0x38] sm:$0xff] }
  0xd8   : > { %v354_v9 = vld [vmem:[#allocation3 + $0x10] sm:$0xff]  ;;  %v355_v10 = vld [vmem:[#allocation3 + $0x18] sm:$0xff] }
  0xd9   : > { %330 = vst.msk [vmem:[#allocation3 + $0x28] sm:$0xff] %vm210_vm0, %v322_v6  ;;  %329 = vst.msk [vmem:[#allocation3 + $0x20] sm:$0xff] %vm210_vm0, %v321_v7  ;;  %v991_v13 = vpack.i.bf16 %v355_v10, %v354_v9 }
  0xda   : > { %v267_v14 = vpop.xlane.xlu1 %266  ;;  %v264_v15 = vpop.xlane.xlu0 %263 }
  0xdb   : > { %992 = vperm.xlu1 %985, %v991_v13   ;;  %v275_v16 = vadd.f32 %v267_v14, %v242_v8  ;;  %v274_v17 = vadd.f32 %v264_v15, %v241_v12 }
  0xdc   : > { %v340_v31 = vld [vmem:[#allocation2 + $0x20] sm:$0xff]  ;;  %v341_v32 = vld [vmem:[#allocation2 + $0x28] sm:$0xff] }
  0xdd   : > { %284 = vst.msk [vmem:[#allocation2 + $0x38] sm:$0xff] %vm210_vm0, %v275_v16  ;;  %283 = vst.msk [vmem:[#allocation2 + $0x30] sm:$0xff] %vm210_vm0, %v274_v17  ;;  %v348_v36 = vmul.f32 0.015625, %v340_v31  ;;  %v349_v37 = vmul.f32 0.015625, %v341_v32 }
  0xde   : > { %v316_v20 = vpop.xlane.xlu1 %315  ;;  %v313_v21 = vpop.xlane.xlu0 %312 }
  0xdf   : > { %v324_v24 = vmax.f32 %v292_v18, %v316_v20  ;;  %v323_v25 = vmax.f32 %v291_v19, %v313_v21  ;;  %v1006_v40 = vpack.i.bf16 %v349_v37, %v348_v36  ;;  %v451_v20 = vld [vmem:[%s1419_s1] sm:$0xff] }
  0xe0   : > { %v356_v26 = vld [vmem:[#allocation3 + $0x20] sm:$0xff]  ;;  %v357_v27 = vld [vmem:[#allocation3 + $0x28] sm:$0xff] }
  0xe1   : > { %v996_v28 = vpack.i.bf16 %v357_v27, %v356_v26  ;;  %332 = vst.msk [vmem:[#allocation3 + $0x38] sm:$0xff] %vm210_vm0, %v324_v24  ;;  %331 = vst.msk [vmem:[#allocation3 + $0x30] sm:$0xff] %vm210_vm0, %v323_v25  ;;  %v453_v24 = vld [vmem:[%s1420_s2 + $0x8] sm:$0xff]  ;;  %v454_v25 = vld [vmem:[%s1420_s2 + $0x10] sm:$0xff] }
  0xe2   : > { %v455_v26 = vld [vmem:[%s1420_s2 + $0x18] sm:$0xff]  ;;  %v456_v27 = vld [vmem:[%s1420_s2 + $0x20] sm:$0xff] }
  0xe3   : > { %997 = vperm.xlu1 %985, %v996_v28   ;;  %v457_v28 = vld [vmem:[%s1420_s2 + $0x28] sm:$0xff] }
  0xe4   : > { %v342_v33 = vld [vmem:[#allocation2 + $0x30] sm:$0xff]  ;;  %v343_v34 = vld [vmem:[#allocation2 + $0x38] sm:$0xff] }
  0xe5   : > { %v350_v38 = vmul.f32 0.015625, %v342_v33  ;;  %v351_v39 = vmul.f32 0.015625, %v343_v34 }
  0xe7   : > { %1002 = vperm.xlu1 %985, %v1001_v35   ;;  %v1011_v41 = vpack.i.bf16 %v351_v39, %v350_v38 }
  0xe8   : > { %v358_v42 = vld [vmem:[#allocation3 + $0x30] sm:$0xff]  ;;  %v359_v43 = vld [vmem:[#allocation3 + $0x38] sm:$0xff] }
  0xe9   : > { %v1016_v44 = vpack.i.bf16 %v359_v43, %v358_v42 }
  0xeb   : > { %1007 = vperm.xlu1 %985, %v1006_v40  }
  0xef   : > { %1012 = vperm.xlu1 %985, %v1011_v41  }
  0xf3   : > { %1017 = vperm.xlu1 %985, %v1016_v44  }
 0x152   : > { %v988_v47 = vpop.permute.xlu1 %987 }
 0x153   : > { %v990_v49 = vunpack.i.h.bf16 %v988_v47  ;;  %v989_v50 = vunpack.i.l.bf16 %v988_v47 }
 0x155   : > { %v982_v48 = vpop.permute.xlu0 %981 }
 0x156   : > { %v984_v51 = vunpack.i.h.bf16 %v982_v48  ;;  %v983_v52 = vunpack.i.l.bf16 %v982_v48 }
 0x158   : > { %v443_v53 = vsel %vm362_vm3, %v983_v52, %v989_v50  ;;  %v444_v54 = vsel %vm362_vm3, %v984_v51, %v990_v49 }
 0x159   : > { %v906_v55 = vpack.c.bf16 %v444_v54, %v443_v53 }
 0x15a   : > { %v993_v56 = vpop.permute.xlu1 %992 }
 0x15b   : > { %907 = vmatpush3.bf16.msra.mxu0 %v906_v55  ;;  %v995_v58 = vunpack.i.h.bf16 %v993_v56  ;;  %v994_v59 = vunpack.i.l.bf16 %v993_v56 }
 0x15c   : > { %908 = vmatprep.subr.bf16.mxu0 %v1141_v5 }
 0x162   : > { %v998_v57 = vpop.permute.xlu1 %997 }
 0x163   : > { %v1000_v2 = vunpack.i.h.bf16 %v998_v57  ;;  %v999_v3 = vunpack.i.l.bf16 %v998_v57 }
 0x166   : > { %v1003_v11 = vpop.permute.xlu1 %1002 }
 0x167   : > { %v1005_v60 = vunpack.i.h.bf16 %v1003_v11  ;;  %v1004_v61 = vunpack.i.l.bf16 %v1003_v11 }
 0x169   : > { %v445_v62 = vsel %vm362_vm3, %v1004_v61, %v994_v59  ;;  %v446_v63 = vsel %vm362_vm3, %v1005_v60, %v995_v58 }
 0x16a   : > { %v1008_v0 = vpop.permute.xlu1 %1007  ;;  %v909_v1 = vpack.c.bf16 %v446_v63, %v445_v62 }
 0x16b   : > { %v1010_v4 = vunpack.i.h.bf16 %v1008_v0  ;;  %v1009_v6 = vunpack.i.l.bf16 %v1008_v0 }
 0x16c   : > { %910 = vmatpush3.bf16.msra.mxu0 %v909_v1 }
 0x16d   : > { %911 = vmatprep.subr.bf16.mxu0 %v1141_v5  ;;  %v447_v7 = vsel %vm362_vm3, %v1009_v6, %v999_v3  ;;  %v448_v8 = vsel %vm362_vm3, %v1010_v4, %v1000_v2 }
 0x16e   : > { %v1013_v9 = vpop.permute.xlu1 %1012  ;;  %v912_v10 = vpack.c.bf16 %v448_v8, %v447_v7 }
 0x16f   : > { %v1015_v13 = vunpack.i.h.bf16 %v1013_v9  ;;  %v1014_v14 = vunpack.i.l.bf16 %v1013_v9 }
 0x170   : > { %913 = vmatpush3.bf16.msra.mxu0 %v912_v10 }
 0x171   : > { %914 = vmatprep.subr.bf16.mxu0 %v1141_v5  ;;  %v452_v5 = vld [vmem:[%s1420_s2] sm:$0xff] }
 0x172   : > { %v1018_v12 = vpop.permute.xlu1 %1017  ;;  %893 = vmatprep.mubr.msk.f32.mxu1 %vm534_vm4, %v452_v5 }
 0x173   : > { %v1020_v15 = vunpack.i.h.bf16 %v1018_v12  ;;  %v1019_v16 = vunpack.i.l.bf16 %v1018_v12 }
 0x175   : > { %v449_v17 = vsel %vm362_vm3, %v1014_v14, %v1019_v16  ;;  %v450_v18 = vsel %vm362_vm3, %v1015_v13, %v1020_v15 }
 0x176   : > { %v915_v19 = vpack.c.bf16 %v450_v18, %v449_v17 }
 0x178   : > { %916 = vmatpush3.bf16.msra.mxu0 %v915_v19 }
 0x17b   : > { %889 = vmatmul.mubr.msk.f32.vlgmr.msra.gmra.mrb[0].mxu0 %vm243_vm1, %v451_v20 }
 0x24e   : > { %v529_v21 = vpop.f32.mrb[0].mxu0 }
 0x24f   : > { %v533_v22 = vmax.f32 %v529_v21, 0.0  ;;  %v890_v23 = vpop.f32.mrb[1].mxu0 }
 0x251   : > { %891 = vmatprep.subr.mxu1 %v533_v22 }
 0x252   : > { %892 = vmatpush3.msra.mxu1 %v533_v22 }
 0x253   : > { %894 = vmatmul.mubr.msk.f32.vlgmr.msra.gmra.mrb[0].mxu1 %vm534_vm4, %v453_v24 }
 0x254   : > { %896 = vmatprep.mubr.msk.f32.mxu1 %vm534_vm4, %v454_v25 }
 0x257   : > { %897 = vmatmul.mubr.msk.f32.gmra.mrb[2].mxu1 %vm534_vm4, %v455_v26 }
 0x258   : > { %899 = vmatprep.mubr.msk.f32.mxu1 %vm534_vm4, %v456_v27 }
 0x25b   : > { %900 = vmatmul.mubr.msk.f32.gmra.mrb[4].mxu1 %vm534_vm4, %v457_v28 }
 0x25c   : > { %902 = vmatprep.mubr.msk.f32.mxu1 %vm534_vm4, %v458_v29 }
 0x25f   : > { %903 = vmatmul.mubr.msk.f32.gmra.mrb[6].mxu1 %vm534_vm4, %v459_v30 }
 0x326   : > { %v895_v31 = vpop.f32.mrb[0].mxu1 }
 0x327   : > { %v625_v32 = vpop.f32.mrb[1].mxu1  ;;  %v668_v33 = vsel %vm664_vm5, %v895_v31, 0.0 }
 0x328   : > { %669 = vadd.xlane.f32.xlu0 %v668_v33  ;;  %v665_v34 = vsel %vm664_vm5, %v625_v32, 0.0 }
 0x329   : > { %666 = vadd.xlane.f32.xlu1 %v665_v34 }
 0x32a   : > { %v898_v35 = vpop.f32.mrb[2].mxu1 }
 0x32b   : > { %v635_v36 = vpop.f32.mrb[3].mxu1  ;;  %v674_v37 = vsel %vm664_vm5, %v898_v35, 0.0 }
 0x32c   : > { %v671_v38 = vsel %vm664_vm5, %v635_v36, 0.0 }
 0x32d   : > { %675 = vadd.xlane.f32.xlu1 %v674_v37  ;;  %672 = vadd.xlane.f32.xlu0 %v671_v38 }
 0x32e   : > { %v901_v39 = vpop.f32.mrb[4].mxu1 }
 0x32f   : > { %v645_v40 = vpop.f32.mrb[5].mxu1  ;;  %v680_v41 = vsel %vm664_vm5, %v901_v39, 0.0 }
 0x330   : > { %v677_v42 = vsel %vm664_vm5, %v645_v40, 0.0 }
 0x331   : > { %681 = vadd.xlane.f32.xlu1 %v680_v41  ;;  %678 = vadd.xlane.f32.xlu0 %v677_v42 }
 0x332   : > { %v904_v43 = vpop.f32.mrb[6].mxu1 }
 0x333   : > { %v655_v44 = vpop.f32.mrb[7].mxu1  ;;  %v686_v45 = vsel %vm664_vm5, %v904_v43, 0.0 }
 0x334   : > { %v683_v46 = vsel %vm664_vm5, %v655_v44, 0.0 }
 0x335   : > { %687 = vadd.xlane.f32.xlu1 %v686_v45  ;;  %684 = vadd.xlane.f32.xlu0 %v683_v46 }
 0x3b5   : > { %v670_v47 = vpop.xlane.xlu0 %669 }
 0x3b6   : > { %v843_v48 = vmul.f32 -1.442695, %v670_v47  ;;  %v667_v49 = vpop.xlane.xlu1 %666 }
 0x3b7   : > { %v842_v50 = vmul.f32 -1.442695, %v667_v49 }
 0x3b8   : > { %1021 = vpow2.f32 %v843_v48 }
 0x3b9   : > { %1023 = vpow2.f32 %v842_v50 }
 0x3ba   : > { %v676_v51 = vpop.xlane.xlu1 %675  ;;  %v673_v52 = vpop.xlane.xlu0 %672 }
 0x3bb   : > { %v845_v53 = vmul.f32 -1.442695, %v676_v51  ;;  %v844_v54 = vmul.f32 -1.442695, %v673_v52 }
 0x3bd   : > { %1025 = vpow2.f32 %v845_v53 }
 0x3be   : > { %1027 = vpow2.f32 %v844_v54  ;;  %v682_v55 = vpop.xlane.xlu1 %681  ;;  %v679_v56 = vpop.xlane.xlu0 %678 }
 0x3bf   : > { %v847_v57 = vmul.f32 -1.442695, %v682_v55  ;;  %v846_v11 = vmul.f32 -1.442695, %v679_v56 }
 0x3c1   : > { %1029 = vpow2.f32 %v847_v57 }
 0x3c2   : > { %v1022_v58 = vpop.eup %1021  ;;  %1031 = vpow2.f32 %v846_v11  ;;  %v688_v59 = vpop.xlane.xlu1 %687 }
 0x3c3   : > { %v685_v60 = vpop.xlane.xlu0 %684  ;;  %v1024_v61 = vpop.eup %1023  ;;  %v714_v62 = vadd.f32 1.0, %v1022_v58  ;;  %v849_v63 = vmul.f32 -1.442695, %v688_v59 }
 0x3c4   : > { %v713_v0 = vadd.f32 1.0, %v1024_v61  ;;  %v848_v1 = vmul.f32 -1.442695, %v685_v60 }
 0x3c5   : > { %1033 = vrcp.f32 %v714_v62 }
 0x3c6   : > { %1035 = vrcp.f32 %v713_v0 }
 0x3c7   : > { %v1026_v2 = vpop.eup %1025  ;;  %1037 = vpow2.f32 %v849_v63 }
 0x3c8   : > { %v1028_v3 = vpop.eup %1027  ;;  %v716_v4 = vadd.f32 1.0, %v1026_v2  ;;  %1039 = vpow2.f32 %v848_v1 }
 0x3c9   : > { %v715_v6 = vadd.f32 1.0, %v1028_v3 }
 0x3ca   : > { %1041 = vrcp.f32 %v716_v4 }
 0x3cb   : > { %v1030_v7 = vpop.eup %1029  ;;  %1043 = vrcp.f32 %v715_v6 }
 0x3cc   : > { %v1032_v8 = vpop.eup %1031  ;;  %v718_v9 = vadd.f32 1.0, %v1030_v7 }
 0x3cd   : > { %v717_v10 = vadd.f32 1.0, %v1032_v8 }
 0x3ce   : > { %1045 = vrcp.f32 %v718_v9 }
 0x3cf   : > { %v1034_v12 = vpop.eup %1033  ;;  %1047 = vrcp.f32 %v717_v10 }
 0x3d0   : > { %v1036_v13 = vpop.eup %1035  ;;  %738 = vst.msk [vmem:[%s205_s30 + $0x8] sm:$0xff] %vm210_vm0, %v1034_v12 }
 0x3d1   : > { %v1038_v14 = vpop.eup %1037  ;;  %737 = vst.msk [vmem:[%s205_s30] sm:$0xff] %vm210_vm0, %v1036_v13 }
 0x3d2   : > { %v1040_v15 = vpop.eup %1039  ;;  %v720_v16 = vadd.f32 1.0, %v1038_v14 }
 0x3d3   : > { %v719_v17 = vadd.f32 1.0, %v1040_v15 }
 0x3d4   : > { %v1042_v18 = vpop.eup %1041  ;;  %1049 = vrcp.f32 %v720_v16 }
 0x3d5   : > { %v1044_v19 = vpop.eup %1043  ;;  %740 = vst.msk [vmem:[%s205_s30 + $0x18] sm:$0xff] %vm210_vm0, %v1042_v18  ;;  %1051 = vrcp.f32 %v719_v17 }
 0x3d6   : > { %739 = vst.msk [vmem:[%s205_s30 + $0x10] sm:$0xff] %vm210_vm0, %v1044_v19 }
 0x3d8   : > { %v1046_v20 = vpop.eup %1045 }
 0x3d9   : > { %v1048_v5 = vpop.eup %1047  ;;  %742 = vst.msk [vmem:[%s205_s30 + $0x28] sm:$0xff] %vm210_vm0, %v1046_v20 }
 0x3da   : > { %741 = vst.msk [vmem:[%s205_s30 + $0x20] sm:$0xff] %vm210_vm0, %v1048_v5 }
 0x3de   : > { %v1050_v21 = vpop.eup %1049 }
 0x3df   : > { %v1052_v22 = vpop.eup %1051  ;;  %744 = vst.msk [vmem:[%s205_s30 + $0x38] sm:$0xff] %vm210_vm0, %v1050_v21 }
 0x3e0   : > { %743 = vst.msk [vmem:[%s205_s30 + $0x30] sm:$0xff] %vm210_vm0, %v1052_v22 }
 0x3e1 PF: > { %s16_s17 = sadd.s32 1, %s1133_s17   ;;  %s1425_s12 = smov %s1117_s13 }
 0x3e2   : > { %p13_p9 = scmp.ge.s32.totalorder %s16_s17, 4   ;;  %s1426_s13 = smov %s1121_s14 }
 0x3e3   : > { %s1427_s14 = smov %s1212_s24  ;;  %s1428_s15 = smov %s1129_s16 }
 0x3e4   : > { %s1429_s16 = smov %s1431_s19  ;;  %15 = sbr.rel (!%p13_p9) target bundleno = 4 (0x4), region = 80 }
 0x3eb   :  { %766 = vsyncpa [#allocation5], 1 }
 0x3ec   :  { %768 = vsyncpa [#allocation5 + $0x1], 1 }

</bundles_post_ra>
